<compile_context>
chip_gen: v5e
topology: v5e:2x2
jax: 0.10.0
libtpu: 0.0.40
codegen_flags: <defaults>
</compile_context>

<pallas_src>
import functools
from typing import NamedTuple

import jax
import jax.numpy as jnp
from jax.experimental import pallas as pl
from jax.experimental.pallas import tpu as pltpu

LANE = 128                       # TPU lane width (hidden / action pad target)
SUBLANE = 8                      # f32 sublane height
GRIDLESS_VMEM_BUDGET = 16 << 20  # conservative scoped-VMEM budget (v5e default)
MIN_BATCH_TILE = 512             # floor for the batch-tiled path


def _round_up(x, m):
    return ((x + m - 1) // m) * m


class QNetMeta(NamedTuple):
    n_features: int
    hidden: int
    n_actions: int
    f_pad: int
    h_pad: int


def pack_qnetwork_params(w1, b1, w2, b2):
    """Pack (w1, b1, w2, b2) into ONE zero-padded, sublane-aligned
    (f_pad + 8 + 128 + 8, 128) f32 buffer -> single HBM->VMEM DMA per forward.

    Call this ONCE per weight update, NOT per forward (the pack itself is a
    separate XLA kernel and must stay out of the hot loop).

    Layout (rows):
      [0, f_pad)                  w1  (n_features, hidden) in top-left
      f_pad                       b1  (hidden,)
      [f_pad+8, f_pad+8+128)      w2  (hidden, n_actions) in top-left
      f_pad+8+128                 b2  (n_actions,)
    """
    F, H = w1.shape
    H2, A = w2.shape
    assert H == H2, "w1/w2 hidden dims mismatch"
    assert H <= LANE, f"hidden={H} must be <= {LANE} for this layout"
    assert A <= LANE, f"n_actions={A} must be <= {LANE} for this layout"

    f_pad = _round_up(F, SUBLANE)
    h_pad = LANE
    rows = f_pad + SUBLANE + h_pad + SUBLANE
    p = jnp.zeros((rows, LANE), jnp.float32)
    p = p.at[:F, :H].set(w1.astype(jnp.float32))
    p = p.at[f_pad, :H].set(jnp.reshape(b1, (-1,)).astype(jnp.float32))
    p = p.at[f_pad + SUBLANE:f_pad + SUBLANE + H, :A].set(w2.astype(jnp.float32))
    p = p.at[f_pad + SUBLANE + h_pad, :A].set(jnp.reshape(b2, (-1,)).astype(jnp.float32))
    return p, QNetMeta(F, H, A, f_pad, h_pad)


def _qnet_kernel(x_ref, p_ref, out_ref, *, f_pad, h_pad, n_actions, reduce_max):
    # x_ref:   (TB, f_pad)                     padded observations
    # p_ref:   (f_pad + 16 + h_pad, LANE)      packed, padded parameters
    # out_ref: (TB, LANE) full Q-vector (lane-dense) or (TB, 1) fused max.
    x = x_ref[...]
    w1 = p_ref[0:f_pad, :]
    b1 = p_ref[f_pad:f_pad + 1, :]
    w2 = p_ref[f_pad + SUBLANE:f_pad + SUBLANE + h_pad, :]
    b2 = p_ref[f_pad + SUBLANE + h_pad:f_pad + SUBLANE + h_pad + 1, :]

    h = jnp.dot(x, w1, preferred_element_type=jnp.float32) + b1
    h = jnp.maximum(h, 0.0)  # ReLU
    q = jnp.dot(h, w2, preferred_element_type=jnp.float32) + b2

    if reduce_max:
        # Fused DQN target: max over real action lanes; padded lanes -> -inf.
        lane = jax.lax.broadcasted_iota(jnp.int32, q.shape, 1)
        q = jnp.where(lane < n_actions, q, -jnp.inf)
        out_ref[...] = jnp.max(q, axis=-1, keepdims=True).astype(out_ref.dtype)
    else:
        out_ref[...] = q.astype(out_ref.dtype)


def qnetwork_forward_packed(x, packed_params, meta, *, reduce_max=False,
                            batch_tile=None):
    """Fused QNetwork forward from pre-packed params.

    x: (B, n_features) f32.
    Returns (B, n_actions) Q-values, or (B,) max_a Q if reduce_max=True.

    Default: single gridless pallas_call (whole arrays in VMEM) — used for all
    batch sizes whose footprint fits a conservative 16 MiB budget.  Only for
    very large B (or when batch_tile is given) does it fall back to a 1-D grid
    over >=512-row batch tiles with the packed params VMEM-resident.
    """
    B, F = x.shape
    assert F == meta.n_features, "feature dim mismatch with packed params"
    f_pad, h_pad, A = meta.f_pad, meta.h_pad, meta.n_actions
    a_pad = LANE
    out_cols = 1 if reduce_max else a_pad

    b_al = _round_up(B, SUBLANE)
    x_p = x
    if (f_pad != F) or (b_al != B):
        x_p = jnp.pad(x, ((0, b_al - B), (0, f_pad - F)))

    kernel = functools.partial(_qnet_kernel, f_pad=f_pad, h_pad=h_pad,
                               n_actions=A, reduce_max=reduce_max)
    n_param_rows = packed_params.shape[0]
    param_bytes = 4 * n_param_rows * LANE

    def cost(rows):
        # Real (padded) traffic, not logical tensor sizes.
        return pl.CostEstimate(
            flops=2 * rows * (f_pad * h_pad + h_pad * a_pad),
            transcendentals=0,
            bytes_accessed=4 * rows * (f_pad + out_cols) + param_bytes,
        )

    gridless_bytes = 4 * b_al * (f_pad + out_cols) + param_bytes
    use_gridless = (batch_tile is None) and (gridless_bytes <= GRIDLESS_VMEM_BUDGET)

    if use_gridless:
        out_p = pl.pallas_call(
            kernel,
            out_shape=jax.ShapeDtypeStruct((b_al, out_cols), jnp.float32),
            in_specs=[
                pl.BlockSpec(memory_space=pltpu.MemorySpace.VMEM),
                pl.BlockSpec(memory_space=pltpu.MemorySpace.VMEM),
            ],
            out_specs=pl.BlockSpec(memory_space=pltpu.MemorySpace.VMEM),
            cost_estimate=cost(b_al),
        )(x_p, packed_params)
    else:
        # Batch-tiled path: >=512-row tiles (multiple of 256).
        tb = max(MIN_BATCH_TILE, _round_up(batch_tile or MIN_BATCH_TILE, 256))
        b_pad = _round_up(b_al, tb)
        if b_pad != b_al:
            x_p = jnp.pad(x_p, ((0, b_pad - b_al), (0, 0)))
        n_tiles = b_pad // tb
        # Only shard across v7x's 2 TCs when each core gets >=2 big tiles;
        # otherwise the split just duplicates the param DMA. No-op on v5e/v6e.
        sem = "parallel" if n_tiles >= 4 else "arbitrary"
        out_p = pl.pallas_call(
            kernel,
            out_shape=jax.ShapeDtypeStruct((b_pad, out_cols), jnp.float32),
            grid=(n_tiles,),
            in_specs=[
                pl.BlockSpec((tb, f_pad), lambda i: (i, 0)),
                # Same block every iteration -> packed params stay VMEM-resident.
                pl.BlockSpec((n_param_rows, LANE), lambda i: (0, 0)),
            ],
            out_specs=pl.BlockSpec((tb, out_cols), lambda i: (i, 0)),
            compiler_params=pltpu.CompilerParams(dimension_semantics=(sem,)),
            cost_estimate=cost(b_pad),
        )(x_p, packed_params)

    if reduce_max:
        return out_p[:B, 0]
    return out_p[:B, :A]


def qnetwork_forward(x, w1, b1, w2, b2, **kwargs):
    """Convenience wrapper that packs then runs.  For hot loops, call
    pack_qnetwork_params() once and use qnetwork_forward_packed() instead."""
    packed, meta = pack_qnetwork_params(w1, b1, w2, b2)
    return qnetwork_forward_packed(x, packed, meta, **kwargs)


def init_qnetwork_params(key, n_features, n_actions, hidden=40):
    """Matches PyTorch nn.Linear default init: U(-1/sqrt(fan_in), 1/sqrt(fan_in))
    for weight and bias.  Weights stored (in, out) so kernel does x @ W
    (== PyTorch x @ W.T)."""
    k1, k2, k3, k4 = jax.random.split(key, 4)
    bound1 = 1.0 / jnp.sqrt(jnp.float32(n_features))
    bound2 = 1.0 / jnp.sqrt(jnp.float32(hidden))
    w1 = jax.random.uniform(k1, (n_features, hidden), jnp.float32, -bound1, bound1)
    b1 = jax.random.uniform(k2, (1, hidden), jnp.float32, -bound1, bound1)
    w2 = jax.random.uniform(k3, (hidden, n_actions), jnp.float32, -bound2, bound2)
    b2 = jax.random.uniform(k4, (1, n_actions), jnp.float32, -bound2, bound2)
    return w1, b1, w2, b2


if __name__ == "__main__":
    key = jax.random.PRNGKey(0)
    k_x, k_x2, k_p = jax.random.split(key, 3)

    batch = 8
    n_features = 8     # e.g. LunarLander-style observation size
    n_actions = 4
    hidden = 40        # fixed by the module definition

    x = jax.random.normal(k_x, (batch, n_features), jnp.float32)
    w1, b1, w2, b2 = init_qnetwork_params(k_p, n_features, n_actions, hidden)

    # Pack ONCE (would be re-done only when weights change in an RL loop).
    packed, meta = pack_qnetwork_params(w1, b1, w2, b2)

    # Pure-JAX reference of the module forward.
    def ref_fwd(xx):
        return jnp.maximum(xx @ w1 + b1, 0.0) @ w2 + b2

    # 1) Gridless path: full Q-vector output.
    out = jax.block_until_ready(qnetwork_forward_packed(x, packed, meta))
    assert out.shape == (batch, n_actions)
    assert jnp.allclose(out, ref_fwd(x), atol=1e-5, rtol=1e-5)

    # 2) Gridless path with the fused DQN consumer: max_a Q(s, a).
    qmax = jax.block_until_ready(
        qnetwork_forward_packed(x, packed, meta, reduce_max=True))
    assert qmax.shape == (batch,)
    assert jnp.allclose(qmax, ref_fwd(x).max(axis=-1), atol=1e-5, rtol=1e-5)

    # 3) Batch-tiled path (explicit request), 512-row tile floor, 2 tiles.
    xb = jax.random.normal(k_x2, (1024, n_features), jnp.float32)
    out_t = jax.block_until_ready(
        qnetwork_forward_packed(xb, packed, meta, batch_tile=512))
    assert out_t.shape == (1024, n_actions)
    assert jnp.allclose(out_t, ref_fwd(xb), atol=1e-5, rtol=1e-5)

    print("KERNEL_OK")
</pallas_src>

<mosaic_0001>
module attributes {stable_mosaic.version = 11 : i64} {
  func.func @_qnet_kernel(%arg0: memref<8x8xf32, #tpu.memory_space<vmem>>, %arg1: memref<152x128xf32, #tpu.memory_space<vmem>>, %arg2: memref<8x128xf32, #tpu.memory_space<vmem>>) attributes {dimension_semantics = [], scalar_prefetch = 0 : i64, scratch_operands = 0 : i64, tpu.core_type = #tpu.core_type<tc>} {
    %c0 = arith.constant 0 : index
    %c0_0 = arith.constant 0 : index
    %0 = vector.load %arg0[%c0, %c0_0] : memref<8x8xf32, #tpu.memory_space<vmem>>, vector<8x8xf32>
    %c0_1 = arith.constant 0 : index
    %c0_2 = arith.constant 0 : index
    %1 = vector.load %arg1[%c0_1, %c0_2] : memref<152x128xf32, #tpu.memory_space<vmem>>, vector<8x128xf32>
    %c8 = arith.constant 8 : index
    %c0_3 = arith.constant 0 : index
    %2 = vector.load %arg1[%c8, %c0_3] : memref<152x128xf32, #tpu.memory_space<vmem>>, vector<1x128xf32>
    %c16 = arith.constant 16 : index
    %c0_4 = arith.constant 0 : index
    %3 = vector.load %arg1[%c16, %c0_4] : memref<152x128xf32, #tpu.memory_space<vmem>>, vector<128x128xf32>
    %c144 = arith.constant 144 : index
    %c0_5 = arith.constant 0 : index
    %4 = vector.load %arg1[%c144, %c0_5] : memref<152x128xf32, #tpu.memory_space<vmem>>, vector<1x128xf32>
    %cst = arith.constant dense<0.000000e+00> : vector<8x128xf32>
    %5 = tpu.matmul %0, %1, %cst {dimension_numbers = #tpu.dot_dimension_numbers<[1], [0], [0], [1], [0, 0, 1, 1], [], []>} : vector<8x8xf32>, vector<8x128xf32>, vector<8x128xf32> -> vector<8x128xf32>
    %6 = vector.broadcast %2 : vector<1x128xf32> to vector<8x128xf32>
    %7 = arith.addf %5, %6 : vector<8x128xf32>
    %cst_6 = arith.constant 0.000000e+00 : f32
    %8 = vector.broadcast %cst_6 : f32 to vector<8x128xf32>
    %9 = arith.maximumf %7, %8 : vector<8x128xf32>
    %cst_7 = arith.constant dense<0.000000e+00> : vector<8x128xf32>
    %10 = tpu.matmul %9, %3, %cst_7 {dimension_numbers = #tpu.dot_dimension_numbers<[1], [0], [0], [1], [0, 0, 1, 1], [], []>} : vector<8x128xf32>, vector<128x128xf32>, vector<8x128xf32> -> vector<8x128xf32>
    %11 = vector.broadcast %4 : vector<1x128xf32> to vector<8x128xf32>
    %12 = arith.addf %10, %11 : vector<8x128xf32>
    %c0_8 = arith.constant 0 : index
    %c0_9 = arith.constant 0 : index
    %13 = vector.load %arg2[%c0_8, %c0_9] : memref<8x128xf32, #tpu.memory_space<vmem>>, vector<8x128xf32>
    tpu.vector_store %arg2[%c0_8, %c0_9], %12 {strides = array<i32>} : memref<8x128xf32, #tpu.memory_space<vmem>>, vector<8x128xf32>,
    return
  }
}

</mosaic_0001>

<bundles_post_ra>
// kernel: tpu_custom_call.1
= control target key start
LH: loop header
LB: loop body
LE: loop exit
PB: predicated region body
PF: predicated region fallthrough
CT: control target
= control target key end

     0   :  { %7 = vsyncpa [#allocation3], 0  ;;  %s243_s0 = inlined_call_operand.hbm [shape: f32[8,8], index: 0, kind: input, shape index: {}]   ;;  %s244_s1 = inlined_call_operand.hbm [shape: f32[152,128], index: 1, kind: input, shape index: {}]   ;;  %s245_s2 = inlined_call_operand.hbm [shape: f32[8,128], index: 2, kind: output, shape index: {}]  }
   0x1   :  { %8 = vsyncpa [#allocation6], 0 }
   0x2   :  { %9 = vsyncpa [#allocation4], 0  ;;  %s15_s11 = sshll.u32 %s243_s0, 4  ;;  %s214_s12 = smov [#allocation2]   ;;  %s16_s11 = int_to_ptr.hbm [resolvable:$true] %s15_s11 }
   0x3   :  { %s17_s13 = sshll.u32 %s214_s12, 4  ;;  %s25_s16 = sshll.u32 %s244_s1, 4  ;;  %s18_s13 = int_to_ptr.vmem [resolvable:$true] %s17_s13  ;;  %s26_s16 = int_to_ptr.hbm [resolvable:$true] %s25_s16 }
   0x4   :  { %20 = dma.hbm_to_vmem [thread:$0]  %s16_s11, 128, %s18_s13, [#allocation3]  }
   0x5   :  { %s215_s17 = smov [#allocation5]   ;;  %s216_s19 = smov 128  }
   0x6   :  { %s27_s18 = sshll.u32 %s215_s17, 4  ;;  %s217_s20 = smov 8   ;;  %s28_s18 = int_to_ptr.vmem [resolvable:$true] %s27_s18 }
   0x7   :  { %33 = dma.hbm_to_vmem [thread:$0]  %s26_s16, 2432, %s28_s18, [#allocation6], %s216_s19, %s216_s19, %s217_s20  }
   0x8   :  { %208 = dma.done.wait [#allocation3], 128  }
   0x9   :  { %209 = vsyncadd [#allocation3], 4294967168 }
   0xa   :  { %210 = dma.done.wait [#allocation6], 2432  }
   0xb   :  { %211 = vsyncadd [#allocation6], 4294964864  ;;  %vm63_vm0 = vcmask 64512   ;;  %v43_v0 = vld [vmem:[#allocation5] sm:$0xff]  ;;  %v42_v1 = vld [vmem:[#allocation2] sm:$0xff]  ;;  %s218_s0 = smov [#allocation7]  }
   0xc   :  { %v60_v2 = vld [vmem:[#allocation5 + $0x88] sm:$0xff]  ;;  %82 = vmatpush.msra.mxu0 %v43_v0  ;;  %v59_v3 = vld [vmem:[#allocation5 + $0x80] sm:$0xff]  ;;  %v58_v4 = vld [vmem:[#allocation5 + $0x78] sm:$0xff]  ;;  %s115_s1 = sshll.u32 %s218_s0, 4  ;;  %s117_s23 = sshll.u32 %s245_s2, 4  ;;  %s116_s1 = int_to_ptr.vmem [resolvable:$true] %s115_s1  ;;  %s118_s23 = int_to_ptr.hbm [resolvable:$true] %s117_s23 }
   0xd   :  { %89 = vmatpush.msra.mxu1 %v60_v2  ;;  %128 = vmatmul.msk.f32.vlgmr.msra.gmra.mxu0 %vm63_vm0, %v42_v1  ;;  %v57_v5 = vld [vmem:[#allocation5 + $0x70] sm:$0xff]  ;;  %v56_v6 = vld [vmem:[#allocation5 + $0x68] sm:$0xff]  ;;  %v55_v7 = vld [vmem:[#allocation5 + $0x60] sm:$0xff] }
   0xe   :  { %v54_v8 = vld [vmem:[#allocation5 + $0x58] sm:$0xff]  ;;  %v53_v9 = vld [vmem:[#allocation5 + $0x50] sm:$0xff]  ;;  %v52_v10 = vld [vmem:[#allocation5 + $0x48] sm:$0xff] }
   0xf   :  { %90 = vmatpush.msra.mxu1 %v59_v3  ;;  %v51_v11 = vld [vmem:[#allocation5 + $0x40] sm:$0xff]  ;;  %v50_v12 = vld [vmem:[#allocation5 + $0x38] sm:$0xff]  ;;  %v49_v13 = vld [vmem:[#allocation5 + $0x30] sm:$0xff] }
  0x10   :  { %v48_v14 = vld [vmem:[#allocation5 + $0x28] sm:$0xff]  ;;  %v47_v15 = vld [vmem:[#allocation5 + $0x20] sm:$0xff]  ;;  %v46_v16 = vld [vmem:[#allocation5 + $0x18] sm:$0xff] }
  0x11   :  { %91 = vmatpush.msra.mxu1 %v58_v4  ;;  %v45_v17 = vld [vmem:[#allocation5 + $0x10] sm:$0xff]  ;;  %v134_v18 = vld [vmem:[#allocation5 + $0x8] ss:$0 sm:$0xff] }
  0x12   :  { %v135_v22 = vld [vmem:[#allocation5 + $0x90] ss:$0 sm:$0xff] }
  0x13   :  { %92 = vmatpush.msra.mxu1 %v57_v5 }
  0x15   :  { %93 = vmatpush.msra.mxu1 %v56_v6 }
  0x17   :  { %94 = vmatpush.msra.mxu1 %v55_v7 }
  0x19   :  { %95 = vmatpush.msra.mxu1 %v54_v8 }
  0x1b   :  { %96 = vmatpush.msra.mxu1 %v53_v9 }
  0x1d   :  { %97 = vmatpush.msra.mxu1 %v52_v10 }
  0x1f   :  { %98 = vmatpush.msra.mxu1 %v51_v11 }
  0x21   :  { %99 = vmatpush.msra.mxu1 %v50_v12 }
  0x23   :  { %100 = vmatpush.msra.mxu1 %v49_v13 }
  0x25   :  { %101 = vmatpush.msra.mxu1 %v48_v14 }
  0x27   :  { %102 = vmatpush.msra.mxu1 %v47_v15 }
  0x29   :  { %103 = vmatpush.msra.mxu1 %v46_v16 }
  0x2b   :  { %104 = vmatpush.msra.mxu1 %v45_v17 }
  0x8a   :  { %v84_v19 = vpop.f32.mrf.mxu0 }
  0x8b   :  { %v85_v20 = vadd.f32 %v134_v18, %v84_v19 }
  0x8d   :  { %v87_v21 = vmax.f32 %v85_v20, 0.0 }
  0x8f   :  { %105 = vmatmul.f32.vlgmr.msra.gmra.mxu1 %v87_v21 }
 0x10c   :  { %v106_v23 = vpop.f32.mrf.mxu1 }
 0x10d   :  { %v107_v24 = vadd.f32 %v135_v22, %v106_v23 }
 0x10f   :  { %109 = vst [vmem:[#allocation7] sm:$0xff] %v107_v24 }
 0x110   :  { %120 = dma.vmem_to_hbm [thread:$0]  %s116_s1, 128, %s118_s23, [#allocation4]  }
 0x111   :  { %212 = dma.done.wait [#allocation4], 128  }
 0x112   :  { %213 = vsyncadd [#allocation4], 4294967168 }
 0x113   :  { %125 = vsyncpa [#allocation3], 1 }
 0x114   :  { %126 = vsyncpa [#allocation6], 1 }
 0x115   :  { %127 = vsyncpa [#allocation4], 1 }

</bundles_post_ra>
